<compile_context>
chip_gen: v6e
topology: v6e:2x2x1
jax: 0.10.0
libtpu: 0.0.40
codegen_flags: <defaults>
</compile_context>

<pallas_src>
import jax
import jax.numpy as jnp
from jax.experimental import pallas as pl
from jax.experimental.pallas import tpu as pltpu


NEG_SLOPE = 0.01      # PyTorch LeakyReLU default
NUM_CLASSES = 3
LANE = 128            # TPU lane width


def cnn_kernel(patch_ref, wconv_ref, bconv_ref, wfc_ref, bfc_ref, out_ref):
    # patch_ref: (TB*P, K) bf16   wconv_ref: (K, 64) bf16    bconv_ref: (1, 64) f32
    # wfc_ref:   (64, LANE) bf16  bfc_ref:   (1, LANE) f32   out_ref:   (TB, LANE) f32
    TB = out_ref.shape[0]
    BP, K = patch_ref.shape
    P = BP // TB

    # Conv3d (stride == kernel == 3) as a patch matmul on the MXU (bf16 in, f32 acc).
    conv = jnp.dot(patch_ref[...], wconv_ref[...],
                   preferred_element_type=jnp.float32)
    conv = conv + bconv_ref[...]                                        # (TB*P, 64)

    # Dropout(p=0.3) is identity in eval mode; LeakyReLU as a single VPU max.
    conv = jnp.maximum(conv, NEG_SLOPE * conv)

    # MaxPool3d((2,2,2)): conv output spatial is exactly 2x2x2 == P spatial rows per
    # batch element -> a global max over the P rows of each batch element.
    pooled = jnp.max(conv.reshape(TB, P, conv.shape[-1]), axis=1)       # (TB, 64) f32

    # Linear(64,3) padded to LANE output columns (lane-dense MXU result).  Padded
    # columns carry a -1e30 bias so they contribute exp(...) = 0 in the softmax.
    logits = jnp.dot(pooled.astype(wfc_ref.dtype), wfc_ref[...],
                     preferred_element_type=jnp.float32) + bfc_ref[...]  # (TB, LANE)

    # Softmax over classes (dim=1) with an exact divide (plenty of EUP/VPU slack).
    m = jnp.max(logits, axis=1, keepdims=True)
    e = jnp.exp(logits - m)
    out_ref[...] = e / jnp.sum(e, axis=1, keepdims=True)


def cnn_forward(x, wconv, bconv, wfc, bfc, *, tile_b=1024):
    """x: (B, C, D, H, W) float32, NCDHW like PyTorch."""
    B, C, D, H, W = x.shape
    assert D % 3 == 0 and H % 3 == 0 and W % 3 == 0, "spatial dims must be multiples of 3"
    Do, Ho, Wo = D // 3, H // 3, W // 3
    # MaxPool3d(2) + Linear(64,3) require the conv output to be exactly 2x2x2
    # (so that flatten == 64 features), i.e. 6x6x6 spatial input.
    assert (Do, Ho, Wo) == (2, 2, 2), "CNNModel requires 6x6x6 spatial input"
    P = Do * Ho * Wo                                    # 8 spatial patches / elt
    K = C * 27                                          # patch feature width (108)
    C_out = wconv.shape[0]                              # 64

    # Non-overlapping 3x3x3 patch extraction (stride == kernel): one fused XLA
    # transpose+convert pass, written as bf16 (half the materialization traffic),
    # no K padding in HBM, flattened to 2-D so the kernel needs no input reshape.
    xr = x.reshape(B, C, Do, 3, Ho, 3, Wo, 3)
    xr = jnp.transpose(xr, (0, 2, 4, 6, 1, 3, 5, 7))    # (B, Do, Ho, Wo, C, 3, 3, 3)
    patches = xr.reshape(B * P, K).astype(jnp.bfloat16)                 # (B*P, K)

    # Conv weight (out_c, in_c, 3, 3, 3) -> (K, out_c) bf16; bias stays f32.
    wconv_mat = wconv.reshape(C_out, K).T.astype(jnp.bfloat16)          # (K, 64)
    bconv_row = bconv.reshape(1, C_out).astype(jnp.float32)             # (1, 64)

    # FC weight (3, 64) -> (64, LANE) bf16 with zero-padded class columns; padded
    # bias entries are -1e30 so the padded classes vanish in the softmax.
    wfc_mat = jnp.pad(wfc.T.astype(jnp.bfloat16),
                      ((0, 0), (0, LANE - NUM_CLASSES)))                # (64, LANE)
    bfc_row = jnp.full((1, LANE), -1e30, dtype=jnp.float32)
    bfc_row = bfc_row.at[0, :NUM_CLASSES].set(bfc.astype(jnp.float32))  # (1, LANE)

    # Batch tiling: large tiles amortize the ~0.35us/step overhead; if the whole
    # batch would otherwise be a single tile, split into >=2 tiles so the
    # "parallel" grid axis actually distributes work across v7x's 2 TensorCores.
    tb = min(tile_b, B)
    if tb == B and B >= 16:
        tb = ((pl.cdiv(B, 2) + 7) // 8) * 8
    grid = (pl.cdiv(B, tb),)

    # Double-buffered VMEM footprint at tb=1024:
    #   patches 2 * tb*P*K*2B  ~= 3.4 MiB, output 2 * tb*LANE*4B = 1 MiB, weights ~tiny.
    vmem_limit = 32 * 1024 * 1024

    out_padded = pl.pallas_call(
        cnn_kernel,
        out_shape=jax.ShapeDtypeStruct((B, LANE), jnp.float32),
        grid_spec=pltpu.PrefetchScalarGridSpec(
            num_scalar_prefetch=0,
            grid=grid,
            in_specs=[
                pl.BlockSpec((tb * P, K), lambda b: (b, 0)),      # batch-tiled patches
                pl.BlockSpec((K, C_out), lambda b: (0, 0)),       # resident weights
                pl.BlockSpec((1, C_out), lambda b: (0, 0)),
                pl.BlockSpec((C_out, LANE), lambda b: (0, 0)),
                pl.BlockSpec((1, LANE), lambda b: (0, 0)),
            ],
            out_specs=pl.BlockSpec((tb, LANE), lambda b: (b, 0)),
        ),
        compiler_params=pltpu.CompilerParams(
            dimension_semantics=("parallel",),   # shard batch tiles across TCs (v7x)
            vmem_limit_bytes=vmem_limit,
        ),
    )(patches, wconv_mat, bconv_row, wfc_mat, bfc_row)

    return out_padded[:, :NUM_CLASSES]


def reference_forward(x, wconv, bconv, wfc, bfc):
    """Pure-JAX f32 reference matching the PyTorch module (eval mode)."""
    conv = jax.lax.conv_general_dilated(
        x, wconv, window_strides=(3, 3, 3), padding="VALID",
        dimension_numbers=("NCDHW", "OIDHW", "NCDHW"))
    conv = conv + bconv.reshape(1, -1, 1, 1, 1)
    conv = jnp.where(conv > 0, conv, NEG_SLOPE * conv)
    # conv output spatial is exactly 2x2x2 -> MaxPool3d(2) is a global spatial max.
    pooled = jnp.max(conv, axis=(2, 3, 4))                   # (B, 64)
    logits = pooled @ wfc.T + bfc
    return jax.nn.softmax(logits, axis=1)


if __name__ == "__main__":
    # Shapes consistent with the module: Linear input dim 64 requires post-pool
    # spatial 1x1x1 -> input spatial = 6.
    B, C, D = 2, 4, 6
    key = jax.random.PRNGKey(0)
    kx, kw1, kb1, kw2, kb2 = jax.random.split(key, 5)

    x = jax.random.normal(kx, (B, C, D, D, D), dtype=jnp.float32)
    wconv = jax.random.normal(kw1, (64, C, 3, 3, 3), dtype=jnp.float32) * 0.05
    bconv = jax.random.normal(kb1, (64,), dtype=jnp.float32) * 0.05
    wfc = jax.random.normal(kw2, (3, 64), dtype=jnp.float32) * 0.1
    bfc = jax.random.normal(kb2, (3,), dtype=jnp.float32) * 0.1

    out = jax.block_until_ready(cnn_forward(x, wconv, bconv, wfc, bfc))
    ref = jax.block_until_ready(reference_forward(x, wconv, bconv, wfc, bfc))

    assert out.shape == (B, 3)
    assert bool(jnp.all(jnp.isfinite(out)))
    # exact divide in the softmax -> rows sum to 1 up to f32 rounding
    assert bool(jnp.allclose(jnp.sum(out, axis=1), 1.0, atol=1e-3))
    # bf16 matmul operands -> loose tolerance vs the f32 reference
    assert bool(jnp.allclose(out, ref, atol=2e-2))
    print("KERNEL_OK")
</pallas_src>

<mosaic_0001>
module attributes {stable_mosaic.version = 11 : i64} {
  func.func @cnn_kernel(%arg0: i32, %arg1: memref<16x108xbf16, #tpu.memory_space<vmem>>, %arg2: memref<108x64xbf16, #tpu.memory_space<vmem>>, %arg3: memref<1x64xf32, #tpu.memory_space<vmem>>, %arg4: memref<64x128xbf16, #tpu.memory_space<vmem>>, %arg5: memref<1x128xf32, #tpu.memory_space<vmem>>, %arg6: memref<2x128xf32, #tpu.memory_space<vmem>>) attributes {dimension_semantics = [#tpu.dimension_semantics<parallel>], iteration_bounds = array<i64: 1>, scalar_prefetch = 0 : i64, scratch_operands = 0 : i64, tpu.core_type = #tpu.core_type<tc>, window_params = [{transform_indices = @transform_0, window_bounds = array<i64: 16, 108>}, {pipeline_mode = #tpu.pipeline_mode<synchronous>, transform_indices = @transform_1, window_bounds = array<i64: 108, 64>}, {pipeline_mode = #tpu.pipeline_mode<synchronous>, transform_indices = @transform_2, window_bounds = array<i64: 1, 64>}, {pipeline_mode = #tpu.pipeline_mode<synchronous>, transform_indices = @transform_3, window_bounds = array<i64: 64, 128>}, {pipeline_mode = #tpu.pipeline_mode<synchronous>, transform_indices = @transform_4, window_bounds = array<i64: 1, 128>}, {transform_indices = @transform_5, window_bounds = array<i64: 2, 128>}]} {
    %c0 = arith.constant 0 : index
    %c0_0 = arith.constant 0 : index
    %0 = vector.load %arg1[%c0, %c0_0] : memref<16x108xbf16, #tpu.memory_space<vmem>>, vector<16x108xbf16>
    %c0_1 = arith.constant 0 : index
    %c0_2 = arith.constant 0 : index
    %1 = vector.load %arg2[%c0_1, %c0_2] : memref<108x64xbf16, #tpu.memory_space<vmem>>, vector<108x64xbf16>
    %cst = arith.constant dense<0.000000e+00> : vector<16x64xf32>
    %2 = tpu.matmul %0, %1, %cst {dimension_numbers = #tpu.dot_dimension_numbers<[1], [0], [0], [1], [0, 0, 1, 1], [], []>} : vector<16x108xbf16>, vector<108x64xbf16>, vector<16x64xf32> -> vector<16x64xf32>
    %c0_3 = arith.constant 0 : index
    %c0_4 = arith.constant 0 : index
    %3 = vector.load %arg3[%c0_3, %c0_4] : memref<1x64xf32, #tpu.memory_space<vmem>>, vector<1x64xf32>
    %4 = vector.broadcast %3 : vector<1x64xf32> to vector<16x64xf32>
    %5 = arith.addf %2, %4 : vector<16x64xf32>
    %cst_5 = arith.constant 0.00999999977 : f32
    %6 = vector.broadcast %cst_5 : f32 to vector<16x64xf32>
    %7 = arith.mulf %6, %5 : vector<16x64xf32>
    %8 = arith.maximumf %5, %7 : vector<16x64xf32>
    %9 = vector.shape_cast %8 : vector<16x64xf32> to vector<2x8x64xf32>
    %cst_6 = arith.constant dense<0xFF800000> : vector<2x64xf32>
    %10 = vector.multi_reduction <maximumf>, %9, %cst_6 [1] : vector<2x8x64xf32> to vector<2x64xf32>
    %11 = arith.truncf %10 : vector<2x64xf32> to vector<2x64xbf16>
    %c0_7 = arith.constant 0 : index
    %c0_8 = arith.constant 0 : index
    %12 = vector.load %arg4[%c0_7, %c0_8] : memref<64x128xbf16, #tpu.memory_space<vmem>>, vector<64x128xbf16>
    %cst_9 = arith.constant dense<0.000000e+00> : vector<2x128xf32>
    %13 = tpu.matmul %11, %12, %cst_9 {dimension_numbers = #tpu.dot_dimension_numbers<[1], [0], [0], [1], [0, 0, 1, 1], [], []>} : vector<2x64xbf16>, vector<64x128xbf16>, vector<2x128xf32> -> vector<2x128xf32>
    %c0_10 = arith.constant 0 : index
    %c0_11 = arith.constant 0 : index
    %14 = vector.load %arg5[%c0_10, %c0_11] : memref<1x128xf32, #tpu.memory_space<vmem>>, vector<1x128xf32>
    %15 = vector.broadcast %14 : vector<1x128xf32> to vector<2x128xf32>
    %16 = arith.addf %13, %15 : vector<2x128xf32>
    %cst_12 = arith.constant dense<0xFF800000> : vector<2xf32>
    %17 = vector.multi_reduction <maximumf>, %16, %cst_12 [1] : vector<2x128xf32> to vector<2xf32>
    %18 = vector.shape_cast %17 : vector<2xf32> to vector<2x1xf32>
    %19 = vector.broadcast %18 : vector<2x1xf32> to vector<2x128xf32>
    %20 = arith.subf %16, %19 : vector<2x128xf32>
    %21 = math.exp %20 : vector<2x128xf32>
    %cst_13 = arith.constant dense<0.000000e+00> : vector<2xf32>
    %22 = vector.multi_reduction <add>, %21, %cst_13 [1] : vector<2x128xf32> to vector<2xf32>
    %23 = vector.shape_cast %22 : vector<2xf32> to vector<2x1xf32>
    %24 = vector.broadcast %23 : vector<2x1xf32> to vector<2x128xf32>
    %25 = arith.divf %21, %24 : vector<2x128xf32>
    %c0_14 = arith.constant 0 : index
    %c0_15 = arith.constant 0 : index
    %26 = vector.load %arg6[%c0_14, %c0_15] : memref<2x128xf32, #tpu.memory_space<vmem>>, vector<2x128xf32>
    tpu.vector_store %arg6[%c0_14, %c0_15], %25 {strides = array<i32>} : memref<2x128xf32, #tpu.memory_space<vmem>>, vector<2x128xf32>,
    return
  }
  func.func @transform_0(%arg0: i32) -> (i32, i32) {
    %c0_i32 = arith.constant 0 : i32
    %c0_i32_0 = arith.constant 0 : i32
    return %arg0, %c0_i32 : i32, i32
  }
  func.func @transform_1(%arg0: i32) -> (i32, i32) {
    %c0_i32 = arith.constant 0 : i32
    %c0_i32_0 = arith.constant 0 : i32
    %c0_i32_1 = arith.constant 0 : i32
    return %c0_i32, %c0_i32_0 : i32, i32
  }
  func.func @transform_2(%arg0: i32) -> (i32, i32) {
    %c0_i32 = arith.constant 0 : i32
    %c0_i32_0 = arith.constant 0 : i32
    %c0_i32_1 = arith.constant 0 : i32
    return %c0_i32, %c0_i32_0 : i32, i32
  }
  func.func @transform_3(%arg0: i32) -> (i32, i32) {
    %c0_i32 = arith.constant 0 : i32
    %c0_i32_0 = arith.constant 0 : i32
    %c0_i32_1 = arith.constant 0 : i32
    return %c0_i32, %c0_i32_0 : i32, i32
  }
  func.func @transform_4(%arg0: i32) -> (i32, i32) {
    %c0_i32 = arith.constant 0 : i32
    %c0_i32_0 = arith.constant 0 : i32
    %c0_i32_1 = arith.constant 0 : i32
    return %c0_i32, %c0_i32_0 : i32, i32
  }
  func.func @transform_5(%arg0: i32) -> (i32, i32) {
    %c0_i32 = arith.constant 0 : i32
    %c0_i32_0 = arith.constant 0 : i32
    return %arg0, %c0_i32 : i32, i32
  }
}

</mosaic_0001>

<bundles_post_ra>
// kernel: tpu_custom_call.1
= control target key start
LH: loop header
LB: loop body
LE: loop exit
PB: predicated region body
PF: predicated region fallthrough
CT: control target
= control target key end

     0   :  { %vm95_vm0 = vcmask 1045504   ;;  %v377_v0 = vmov 0.0   ;;  %vm378_vm1 = vmmov 0   ;;  %s458_s0 = inlined_call_operand.vmem [shape: bf16[16,108], index: 0, kind: input, shape index: {}]   ;;  %s459_s1 = inlined_call_operand.vmem [shape: bf16[108,64], index: 1, kind: input, shape index: {}]   ;;  %s460_s2 = inlined_call_operand.vmem [shape: f32[1,64], index: 2, kind: input, shape index: {}]   ;;  %s461_s3 = inlined_call_operand.vmem [shape: bf16[64,128], index: 3, kind: input, shape index: {}]   ;;  %s462_s4 = inlined_call_operand.vmem [shape: f32[1,128], index: 4, kind: input, shape index: {}]   ;;  %s463_s5 = inlined_call_operand.hbm [shape: f32[2,128], index: 5, kind: output, shape index: {}]  }
   0x1   :  { %306 = vmatprep.subr.bf16.mxu0 %v377_v0  ;;  %v339_v1 = vld [vmem:[%s459_s1 + $0x30] sm:$0x3f]   ;;  %324 = vmatprep.subr.bf16.mxu1 %v377_v0  ;;  %v340_v3 = vld [vmem:[%s459_s1 + $0x28] sm:$0xff]   ;;  %v341_v4 = vld [vmem:[%s459_s1 + $0x20] sm:$0xff]  }
   0x2   :  { %v97_v2 = vsel %vm95_vm0, %v339_v1, 0  ;;  %320 = vmatprep.mubr.msk.bf16.mxu0 %vm378_vm1, %v377_v0  ;;  %332 = vmatprep.mubr.msk.bf16.mxu1 %vm378_vm1, %v377_v0 }
   0x3   :  { %307 = vmatpush3.bf16.msra.mxu0 %v97_v2 }
   0x4   :  { %308 = vmatprep.subr.bf16.mxu0 %v377_v0 }
   0x7   :  { %309 = vmatpush3.bf16.msra.mxu0 %v340_v3 }
   0x8   :  { %310 = vmatprep.subr.bf16.mxu0 %v377_v0 }
   0x9   :  { %10 = vsyncpa [#allocation3], 0  ;;  %v342_v5 = vld [vmem:[%s459_s1 + $0x18] sm:$0xff]   ;;  %v343_v6 = vld [vmem:[%s459_s1 + $0x10] sm:$0xff]   ;;  %vm91_vm2 = vcmask 883712   ;;  %vm144_vm3 = vcmask 523264  }
   0xa   :  { %v344_v7 = vld [vmem:[%s459_s1 + $0x8] sm:$0xff]   ;;  %v345_v8 = vld [vmem:[%s459_s1] sm:$0xff]   ;;  %v347_v10 = vld [vmem:[%s461_s3 + $0x18] sm:$0xff]   ;;  %vm180_vm4 = vcmask 1041409   ;;  %vm250_vm5 = vcmask 1041408   ;;  %s379_s17 = smov [#allocation2]  }
   0xb   :  { %311 = vmatpush3.bf16.msra.mxu0 %v341_v4  ;;  %v346_v9 = vld [vmem:[%s458_s0] sm:$0xff]   ;;  %325 = vmatpush3.bf16.msra.mxu1 %v347_v10  ;;  %v348_v11 = vld [vmem:[%s461_s3 + $0x10] sm:$0xff]   ;;  %v349_v12 = vld [vmem:[%s461_s3 + $0x8] sm:$0xff]   ;;  %s269_s18 = sshll.u32 %s379_s17, 4  ;;  %s270_s18 = int_to_ptr.vmem [resolvable:$true] %s269_s18 }
   0xc   :  { %312 = vmatprep.subr.bf16.mxu0 %v377_v0  ;;  %326 = vmatprep.subr.bf16.mxu1 %v377_v0  ;;  %v350_v13 = vld [vmem:[%s461_s3] sm:$0xff]   ;;  %p360_p1 = scmp.lt.s32.totalorder %s270_s18, %s270_s18 }
   0xd   :  { %v277_v14 = vld [vmem:[%s460_s2] ss:$0 sm:$0xff] }
   0xe   :  { %v287_v45 = vld [vmem:[%s462_s4] ss:$0 sm:$0xff]  ;;  %s355_s4 = scalar_lea.vmem %s270_s18, 32 }
   0xf   :  { %313 = vmatpush3.bf16.msra.mxu0 %v342_v5  ;;  %327 = vmatpush3.bf16.msra.mxu1 %v348_v11  ;;  %p356_p0 = scmp.ne.s32.totalorder %s270_s18, %s355_s4  ;;  %p361_p2 = scmp.lt.s32.totalorder %s355_s4, %s355_s4 }
  0x10   :  { %314 = vmatprep.subr.bf16.mxu0 %v377_v0  ;;  %328 = vmatprep.subr.bf16.mxu1 %v377_v0 }
  0x11   :  { %p362_p3 = por %p361_p2, %p360_p1 }
  0x13   :  { %315 = vmatpush3.bf16.msra.mxu0 %v343_v6  ;;  %329 = vmatpush3.bf16.msra.mxu1 %v349_v12  ;;  %p363_p4 = pnand %p362_p3, %p356_p0 }
  0x14   :  { %316 = vmatprep.subr.bf16.mxu0 %v377_v0  ;;  %330 = vmatprep.subr.bf16.mxu1 %v377_v0 }
  0x17   :  { %317 = vmatpush3.bf16.msra.mxu0 %v344_v7  ;;  %331 = vmatpush3.bf16.msra.mxu1 %v350_v13 }
  0x18   :  { %318 = vmatprep.subr.bf16.mxu0 %v377_v0 }
  0x1b   :  { %319 = vmatpush3.bf16.msra.mxu0 %v345_v8 }
  0x1e   :  { %321 = vmatmul.mubr.msk.bf16.vlgmr.msra.gmra.mxu0 %vm91_vm2, %v346_v9 }
  0xde   :  { %v133_v15 = vpop.f32.mrf.mxu0 }
  0xdf   :  { %v134_v16 = vadd.f32 %v277_v14, %v133_v15 }
  0xe0   :  { %v322_v17 = vpop.f32.mrf.mxu0 }
  0xe1   :  { %v140_v18 = vmul.f32 0.01, %v134_v16 }
  0xe2   :  { %v136_v19 = vpop.f32.mrf.mxu0 }
  0xe3   :  { %v142_v20 = vmax.f32 %v134_v16, %v140_v18  ;;  %v137_v21 = vadd.f32 %v277_v14, %v136_v19 }
  0xe4   :  { %v323_v22 = vpop.f32.mrf.mxu0 }
  0xe5   :  { %v141_v23 = vmul.f32 0.01, %v137_v21  ;;  %v145_v24 = vsel %vm144_vm3, %v142_v20, -inf }
  0xe6   :  { %v146_v25 = vrot.slane %v145_v24, 4 }
  0xe7   :  { %v143_v26 = vmax.f32 %v137_v21, %v141_v23 }
  0xe8   :  { %v147_v27 = vmax.f32 %v145_v24, %v146_v25 }
  0xe9   :  { %v152_v28 = vsel %vm144_vm3, %v143_v26, -inf }
  0xea   :  { %v148_v29 = vrot.slane %v147_v27, 2  ;;  %v153_v30 = vrot.slane %v152_v28, 4 }
  0xec   :  { %v149_v31 = vmax.f32 %v147_v27, %v148_v29  ;;  %v154_v32 = vmax.f32 %v152_v28, %v153_v30 }
  0xee   :  { %v150_v33 = vrot.slane %v149_v31, 1  ;;  %v155_v34 = vrot.slane %v154_v32, 2 }
  0xf0   :  { %v151_v35 = vmax.f32 %v149_v31, %v150_v33  ;;  %v156_v36 = vmax.f32 %v154_v32, %v155_v34 }
  0xf2   :  { %v157_v37 = vrot.slane %v156_v36, 1  ;;  %v159_v39 = vpack.c.bf16 %v151_v35, %v151_v35 }
  0xf4   :  { %v158_v38 = vmax.f32 %v156_v36, %v157_v37  ;;  %v178_v41 = vunpack.c.l.b16 %v159_v39 }
  0xf6   :  { %v160_v40 = vpack.c.bf16 %v158_v38, %v158_v38 }
  0xf8   :  { %v179_v42 = vunpack.c.l.b16 %v160_v40 }
  0xfa   :  { %v181_v43 = vsel %vm180_vm4, %v179_v42, %v178_v41 }
  0xfb   :  { %v182_v44 = vpack.c.b16 %v181_v43, %v181_v43 }
  0xfd   :  { %333 = vmatmul.mubr.msk.bf16.vlgmr.msra.gmra.mxu1 %vm144_vm3, %v182_v44 }
 0x1bd   :  { %v244_v46 = vpop.f32.mrf.mxu1 }
 0x1be   :  { %v245_v47 = vadd.f32 %v287_v45, %v244_v46 }
 0x1bf   :  { %v334_v48 = vpop.f32.mrf.mxu1 }
 0x1c0   :  { %v251_v49 = vsel %vm250_vm5, %v245_v47, -inf }
 0x1c1   :  { %252 = vmax.xlane.f32.xlu0 %v251_v49  ;;  %v247_v50 = vpop.f32.mrf.mxu1 }
 0x1c3   :  { %v335_v51 = vpop.f32.mrf.mxu1 }
 0x24a   :  { %v253_v52 = vpop.xlane.xlu0 %252 }
 0x24b   :  { %v254_v53 = vsub.f32 %v245_v47, %v253_v52 }
 0x24d   :  { %v255_v54 = vmul.f32 1.442695, %v254_v53 }
 0x24f   :  { %351 = vpow2.f32 %v255_v54 }
 0x25c   :  { %v352_v55 = vpop.eup %351 }
 0x25d   :  { %v257_v56 = vsel %vm250_vm5, %v352_v55, 0.0 }
 0x25e   :  { %258 = vadd.xlane.f32.xlu0 %v257_v56 }
 0x2e7   :  { %v259_v57 = vpop.xlane.xlu0 %258 }
 0x2e8   :  { %353 = vrcp.f32 %v259_v57 }
 0x2f5   :  { %v354_v58 = vpop.eup %353 }
 0x2f6   :  { %v261_v59 = vmul.f32 %v354_v58, %v352_v55 }
 0x2f8   :  { %262 = vst [vmem:[#allocation2] sm:$0x3] %v261_v59 }
 0x2f9   :  { %366 = shalt.err (!%p363_p4)
}
 0x2fa   :  { %272 = dma.vmem_to_hbm [thread:$0]  %s270_s18, 32, %s463_s5, [#allocation3]  }
 0x2fb   :  { %375 = dma.done.wait [#allocation3], 32  }
 0x2fc   :  { %376 = vsyncadd [#allocation3], 4294967264 }
 0x2fd   :  { %276 = vsyncpa [#allocation3], 1 }

</bundles_post_ra>
